<compile_context>
chip_gen: v7x
topology: tpu7x:2x2x1
jax: 0.10.0
libtpu: 0.0.40
codegen_flags: <defaults>
</compile_context>

<pallas_src>
import functools

import jax
import jax.numpy as jnp
import numpy as np
from jax.experimental import pallas as pl
from jax.experimental.pallas import tpu as pltpu


def softtree_kernel(xT_ref, w_ref, b_ref, mlev_ref, clev_ref, lwT_ref, out_ref,
                    *, eps, depth, n_leaf):
    """One batch tile (batch on lanes) of the SoftTree forward.

    xT_ref   : (Din, TB)        input features, transposed (compute dtype)
    w_ref    : (NIp, Din)       stacked internal-node weights (rows >= NI, zero-padded)
    b_ref    : (NIp, 1)         stacked internal-node biases (f32)
    mlev_ref : (D*NL, NIp)      per-level routing matrix (+1 left, -1 right, 0 off)
    clev_ref : (D*NL, 1)        per-level constants (1 where the step goes right)
    lwT_ref  : (leaf_dims, NL)  leaf weight vectors, transposed (f32)
    out_ref  : (leaf_dims, TB)  output tile (out dtype)
    """
    # Internal-node gating, batch on lanes: (NIp, Din) @ (Din, TB) -> (NIp, TB).
    logits = jnp.dot(w_ref[...], xT_ref[...],
                     preferred_element_type=jnp.float32) + b_ref[...]
    p = jax.nn.sigmoid(logits)                                   # (NIp, TB) f32
    if eps > 0.0:                                                # static branch
        p = jnp.clip(p, eps, 1.0 - eps)

    # One stacked matmul gives every leaf's per-level path factor:
    #   lev[d*NL + l, :] = p[node] (left) or 1 - p[node] (right) at depth d.
    lev = jnp.dot(mlev_ref[...], p,
                  preferred_element_type=jnp.float32) + clev_ref[...]  # (D*NL, TB)

    # Path probability of every leaf = product over depth levels.
    leaf_prob = lev[0:n_leaf, :]
    for d in range(1, depth):
        leaf_prob = leaf_prob * lev[d * n_leaf:(d + 1) * n_leaf, :]

    # Weighted sum of leaf vectors: (leaf_dims, NL) @ (NL, TB) -> (leaf_dims, TB).
    out_ref[...] = jnp.dot(lwT_ref[...], leaf_prob,
                           preferred_element_type=jnp.float32).astype(out_ref.dtype)


def _round_up(x, m):
    return (x + m - 1) // m * m


def choose_batch_tile(batch, input_dim, leaf_dims, depth, n_leaf, n_node_rows,
                      compute_dtype, vmem_budget_bytes=16 * 1024 * 1024,
                      max_tile=8192, target_grid_steps=4):
    """Largest lane tile (multiple of 128) whose double-buffered blocks plus
    f32 intermediates fit the VMEM budget, capped so large batches still get
    several grid steps (megacore sharding + DMA/compute overlap)."""
    in_bytes = jnp.dtype(compute_dtype).itemsize
    pad8 = lambda r: _round_up(max(int(r), 1), 8)        # sublane padding
    bytes_per_lane = (2 * pad8(input_dim) * in_bytes     # x block, double-buffered
                      + 2 * pad8(leaf_dims) * 4          # out block, double-buffered
                      + (pad8(n_node_rows)               # logits / p
                         + pad8(depth * n_leaf)          # lev
                         + 2 * pad8(n_leaf)) * 4)        # leaf_prob + temp
    tb = vmem_budget_bytes // max(bytes_per_lane, 1)
    tb = min(tb, max_tile,
             _round_up(pl.cdiv(max(batch, 1), target_grid_steps), 128))
    return max((int(tb) // 128) * 128, 128)


def build_level_matrices(max_depth, n_node_cols=None):
    """Per-level routing fused into one stacked matrix.

    mlev[d*NL + l, n] = +1 if node n is leaf l's depth-d ancestor and the path
    goes LEFT (factor p_n), -1 if it goes RIGHT (factor 1 - p_n), else 0.
    clev[d*NL + l] = 1 for RIGHT steps (the constant in 1 - p).
    Then leaf_prob[l] = prod_d (mlev @ p + clev)[d*NL + l].
    """
    D = int(max_depth)
    NI = 2 ** D - 1
    NL = 2 ** D
    cols = NI if n_node_cols is None else int(n_node_cols)
    mlev = np.zeros((D * NL, cols), np.float32)
    clev = np.zeros((D * NL, 1), np.float32)
    for l in range(NL):
        node = 0
        for d in range(D):
            go_right = (l >> (D - 1 - d)) & 1
            row = d * NL + l
            if go_right:
                mlev[row, node] = -1.0
                clev[row, 0] = 1.0
                node = 2 * node + 2
            else:
                mlev[row, node] = 1.0
                node = 2 * node + 1
    return jnp.asarray(mlev), jnp.asarray(clev)


def softtree_forward(x, W, b, leaf_W, max_depth, *, internal_eps=0.0,
                     compute_dtype=jnp.bfloat16, out_dtype=jnp.float32,
                     batch_tile=None):
    """Batch-on-lanes, batch-tiled SoftTree forward via pallas_call."""
    B, Din = x.shape
    D = int(max_depth)
    NI = 2 ** D - 1
    NL = 2 ** D
    leaf_dims = leaf_W.shape[1]
    assert W.shape == (NI, Din) and leaf_W.shape == (NL, leaf_dims)

    # Pad the internal-node row count to a sublane multiple (zero rows are
    # harmless: their p values are never referenced by mlev's zero columns).
    NIp = _round_up(NI, 8)
    W_f = jnp.asarray(W, jnp.float32)
    b_f = jnp.asarray(b, jnp.float32).reshape(NI, 1)
    if NIp != NI:
        W_f = jnp.pad(W_f, ((0, NIp - NI), (0, 0)))
        b_f = jnp.pad(b_f, ((0, NIp - NI), (0, 0)))
    w_c = W_f.astype(compute_dtype)                       # (NIp, Din)
    lwT = jnp.asarray(leaf_W, jnp.float32).T              # (leaf_dims, NL)
    mlev, clev = build_level_matrices(D, NIp)             # (D*NL, NIp), (D*NL, 1)

    if batch_tile is None:
        TB = choose_batch_tile(B, Din, leaf_dims, D, NL, NIp, compute_dtype)
    else:
        assert batch_tile % 128 == 0, \
            "batch_tile must be a multiple of 128 (batch lives on lanes)"
        TB = int(batch_tile)

    # Batch-on-lanes layout: one wrapper-side transpose; the tail pad and the
    # dtype cast fuse with it into a single copy pass over x.
    Bp = _round_up(max(B, 1), TB)
    x_c = x.astype(compute_dtype)
    if Bp != B:
        x_c = jnp.pad(x_c, ((0, Bp - B), (0, 0)))
    xT = x_c.T                                            # (Din, Bp)

    grid = (Bp // TB,)
    const = lambda i: (0, 0)                              # resident params

    in_bytes = jnp.dtype(compute_dtype).itemsize
    out_bytes = jnp.dtype(out_dtype).itemsize
    cost = pl.CostEstimate(
        flops=2 * Bp * (Din * NI + NI * D * NL + NL * leaf_dims) + Bp * NL * (D - 1),
        transcendentals=Bp * NI,                          # sigmoid
        bytes_accessed=(Bp * Din * in_bytes + Bp * leaf_dims * out_bytes
                        + NIp * Din * in_bytes + NIp * 4
                        + D * NL * (NIp + 1) * 4 + NL * leaf_dims * 4),
    )

    kernel = functools.partial(softtree_kernel, eps=float(internal_eps),
                               depth=D, n_leaf=NL)

    out_T = pl.pallas_call(
        kernel,
        out_shape=jax.ShapeDtypeStruct((leaf_dims, Bp), out_dtype),
        grid=grid,
        in_specs=[
            pl.BlockSpec((Din, TB), lambda i: (0, i)),    # pipelined x^T tile
            pl.BlockSpec((NIp, Din), const),              # resident node weights
            pl.BlockSpec((NIp, 1), const),                # resident node biases
            pl.BlockSpec((D * NL, NIp), const),           # resident level matrix
            pl.BlockSpec((D * NL, 1), const),             # resident level consts
            pl.BlockSpec((leaf_dims, NL), const),         # resident leaf weights^T
        ],
        out_specs=pl.BlockSpec((leaf_dims, TB), lambda i: (0, i)),
        compiler_params=pltpu.CompilerParams(
            dimension_semantics=("parallel",),            # megacore on v7x
            vmem_limit_bytes=32 * 1024 * 1024,            # safe on every generation
        ),
        cost_estimate=cost,
    )(xT, w_c, b_f, mlev, clev, lwT)

    out = out_T[:, :B].T                                  # (B, leaf_dims)
    # Match PyTorch: prob.unsqueeze(1) * leaf_weights summed -> (B, 1, leaf_dims)
    return out.reshape(B, 1, leaf_dims)


def softtree_reference(x, W, b, leaf_W, max_depth, internal_eps=0.0):
    """Pure-JAX mirror of the recursive PyTorch forward (for verification)."""
    NI = 2 ** max_depth - 1
    NL = 2 ** max_depth
    logits = x @ W.T + b.reshape(1, NI)
    p = jnp.clip(jax.nn.sigmoid(logits), internal_eps, 1.0 - internal_eps)
    out = jnp.zeros((x.shape[0], leaf_W.shape[1]), jnp.float32)
    for l in range(NL):
        idx = NI + l
        prob = jnp.ones((x.shape[0],), jnp.float32)
        while idx > 0:
            parent = (idx - 1) // 2
            if idx == 2 * parent + 1:
                prob = prob * p[:, parent]
            else:
                prob = prob * (1.0 - p[:, parent])
            idx = parent
        out = out + prob[:, None] * leaf_W[l][None, :]
    return out[:, None, :]


if __name__ == "__main__":
    # Shapes consistent with the module: SoftTree(max_depth=3, leaf_dims=8,
    # input_dim=16) on a batch of 8 feature vectors.
    max_depth = 3
    leaf_dims = 8
    input_dim = 16
    batch = 8
    internal_eps = 0.0

    NI = 2 ** max_depth - 1                               # 7 internal nodes
    NL = 2 ** max_depth                                   # 8 leaves

    key = jax.random.PRNGKey(0)
    kx, kw, kb, kl, kx2 = jax.random.split(key, 5)

    # Deterministic parameter init (shapes from __init__):
    #   each internal node: nn.Linear(input_dim, 1)   -> stacked W (NI, Din), b (NI,)
    #   each leaf:          randn(1, leaf_dims) * 0.1 -> stacked (NL, leaf_dims)
    bound = 1.0 / np.sqrt(input_dim)
    W = jax.random.uniform(kw, (NI, input_dim), jnp.float32, -bound, bound)
    b = jax.random.uniform(kb, (NI,), jnp.float32, -bound, bound)
    leaf_W = jax.random.normal(kl, (NL, leaf_dims), jnp.float32) * 0.1
    x = jax.random.normal(kx, (batch, input_dim), jnp.float32)

    ref = softtree_reference(x, W, b, leaf_W, max_depth, internal_eps)

    # 1) f32 compute path: matches the reference.
    out_f32 = softtree_forward(x, W, b, leaf_W, max_depth,
                               internal_eps=internal_eps,
                               compute_dtype=jnp.float32)
    out_f32 = jax.block_until_ready(out_f32)
    assert out_f32.shape == (batch, 1, leaf_dims), out_f32.shape
    np.testing.assert_allclose(np.asarray(out_f32), np.asarray(ref),
                               rtol=1e-4, atol=1e-5)

    # 2) Default bf16-matmul path (f32 accumulation / elementwise) — looser tol.
    out_bf16 = softtree_forward(x, W, b, leaf_W, max_depth,
                                internal_eps=internal_eps,
                                compute_dtype=jnp.bfloat16)
    out_bf16 = jax.block_until_ready(out_bf16)
    np.testing.assert_allclose(np.asarray(out_bf16), np.asarray(ref),
                               rtol=5e-2, atol=2e-2)

    # 3) eps > 0 path (exercises the in-kernel clamp branch).
    ref_eps = softtree_reference(x, W, b, leaf_W, max_depth, 0.01)
    out_eps = softtree_forward(x, W, b, leaf_W, max_depth,
                               internal_eps=0.01, compute_dtype=jnp.float32)
    out_eps = jax.block_until_ready(out_eps)
    np.testing.assert_allclose(np.asarray(out_eps), np.asarray(ref_eps),
                               rtol=1e-4, atol=1e-5)

    # 4) Multi-tile + ragged batch (pad + slice, >1 grid step).
    batch2 = 300
    x2 = jax.random.normal(kx2, (batch2, input_dim), jnp.float32)
    ref2 = softtree_reference(x2, W, b, leaf_W, max_depth, internal_eps)
    out2 = softtree_forward(x2, W, b, leaf_W, max_depth,
                            internal_eps=internal_eps,
                            compute_dtype=jnp.float32, batch_tile=128)
    out2 = jax.block_until_ready(out2)
    assert out2.shape == (batch2, 1, leaf_dims), out2.shape
    np.testing.assert_allclose(np.asarray(out2), np.asarray(ref2),
                               rtol=1e-4, atol=1e-5)

    # TODO(synk): plot_tree is a matplotlib visualization, not a compute op —
    # intentionally not translated to Pallas.
    print("KERNEL_OK")
</pallas_src>

<mosaic_0001>
module attributes {stable_mosaic.version = 11 : i64} {
  func.func @softtree_kernel(%arg0: i32, %arg1: memref<16x128xf32, #tpu.memory_space<vmem>>, %arg2: memref<8x16xf32, #tpu.memory_space<vmem>>, %arg3: memref<8x1xf32, #tpu.memory_space<vmem>>, %arg4: memref<24x8xf32, #tpu.memory_space<vmem>>, %arg5: memref<24x1xf32, #tpu.memory_space<vmem>>, %arg6: memref<8x8xf32, #tpu.memory_space<vmem>>, %arg7: memref<8x128xf32, #tpu.memory_space<vmem>>) attributes {dimension_semantics = [#tpu.dimension_semantics<parallel>], iteration_bounds = array<i64: 1>, scalar_prefetch = 0 : i64, scratch_operands = 0 : i64, tpu.core_type = #tpu.core_type<tc>, window_params = [{transform_indices = @transform_0, window_bounds = array<i64: 16, 128>}, {pipeline_mode = #tpu.pipeline_mode<synchronous>, transform_indices = @transform_1, window_bounds = array<i64: 8, 16>}, {pipeline_mode = #tpu.pipeline_mode<synchronous>, transform_indices = @transform_2, window_bounds = array<i64: 8, 1>}, {pipeline_mode = #tpu.pipeline_mode<synchronous>, transform_indices = @transform_3, window_bounds = array<i64: 24, 8>}, {pipeline_mode = #tpu.pipeline_mode<synchronous>, transform_indices = @transform_4, window_bounds = array<i64: 24, 1>}, {pipeline_mode = #tpu.pipeline_mode<synchronous>, transform_indices = @transform_5, window_bounds = array<i64: 8, 8>}, {transform_indices = @transform_6, window_bounds = array<i64: 8, 128>}]} {
    %c0 = arith.constant 0 : index
    %c0_0 = arith.constant 0 : index
    %0 = vector.load %arg2[%c0, %c0_0] : memref<8x16xf32, #tpu.memory_space<vmem>>, vector<8x16xf32>
    %c0_1 = arith.constant 0 : index
    %c0_2 = arith.constant 0 : index
    %1 = vector.load %arg1[%c0_1, %c0_2] : memref<16x128xf32, #tpu.memory_space<vmem>>, vector<16x128xf32>
    %cst = arith.constant dense<0.000000e+00> : vector<8x128xf32>
    %2 = tpu.matmul %0, %1, %cst {dimension_numbers = #tpu.dot_dimension_numbers<[1], [0], [0], [1], [0, 0, 1, 1], [], []>} : vector<8x16xf32>, vector<16x128xf32>, vector<8x128xf32> -> vector<8x128xf32>
    %c0_3 = arith.constant 0 : index
    %c0_4 = arith.constant 0 : index
    %3 = vector.load %arg3[%c0_3, %c0_4] : memref<8x1xf32, #tpu.memory_space<vmem>>, vector<8x1xf32>
    %4 = vector.broadcast %3 : vector<8x1xf32> to vector<8x128xf32>
    %5 = arith.addf %2, %4 : vector<8x128xf32>
    %6 = arith.negf %5 : vector<8x128xf32>
    %7 = math.exp %6 : vector<8x128xf32>
    %cst_5 = arith.constant 1.000000e+00 : f32
    %8 = vector.broadcast %cst_5 : f32 to vector<8x128xf32>
    %9 = arith.addf %8, %7 : vector<8x128xf32>
    %10 = arith.divf %8, %9 : vector<8x128xf32>
    %c0_6 = arith.constant 0 : index
    %c0_7 = arith.constant 0 : index
    %11 = vector.load %arg4[%c0_6, %c0_7] : memref<24x8xf32, #tpu.memory_space<vmem>>, vector<24x8xf32>
    %cst_8 = arith.constant dense<0.000000e+00> : vector<24x128xf32>
    %12 = tpu.matmul %11, %10, %cst_8 {dimension_numbers = #tpu.dot_dimension_numbers<[1], [0], [0], [1], [0, 0, 1, 1], [], []>} : vector<24x8xf32>, vector<8x128xf32>, vector<24x128xf32> -> vector<24x128xf32>
    %c0_9 = arith.constant 0 : index
    %c0_10 = arith.constant 0 : index
    %13 = vector.load %arg5[%c0_9, %c0_10] : memref<24x1xf32, #tpu.memory_space<vmem>>, vector<24x1xf32>
    %14 = vector.broadcast %13 : vector<24x1xf32> to vector<24x128xf32>
    %15 = arith.addf %12, %14 : vector<24x128xf32>
    %16 = vector.extract_strided_slice %15 {offsets = [0, 0], sizes = [8, 128], strides = [1, 1]} : vector<24x128xf32> to vector<8x128xf32>
    %17 = vector.extract_strided_slice %15 {offsets = [8, 0], sizes = [8, 128], strides = [1, 1]} : vector<24x128xf32> to vector<8x128xf32>
    %18 = arith.mulf %16, %17 : vector<8x128xf32>
    %19 = vector.extract_strided_slice %15 {offsets = [16, 0], sizes = [8, 128], strides = [1, 1]} : vector<24x128xf32> to vector<8x128xf32>
    %20 = arith.mulf %18, %19 : vector<8x128xf32>
    %c0_11 = arith.constant 0 : index
    %c0_12 = arith.constant 0 : index
    %21 = vector.load %arg6[%c0_11, %c0_12] : memref<8x8xf32, #tpu.memory_space<vmem>>, vector<8x8xf32>
    %cst_13 = arith.constant dense<0.000000e+00> : vector<8x128xf32>
    %22 = tpu.matmul %21, %20, %cst_13 {dimension_numbers = #tpu.dot_dimension_numbers<[1], [0], [0], [1], [0, 0, 1, 1], [], []>} : vector<8x8xf32>, vector<8x128xf32>, vector<8x128xf32> -> vector<8x128xf32>
    %c0_14 = arith.constant 0 : index
    %c0_15 = arith.constant 0 : index
    %23 = vector.load %arg7[%c0_14, %c0_15] : memref<8x128xf32, #tpu.memory_space<vmem>>, vector<8x128xf32>
    tpu.vector_store %arg7[%c0_14, %c0_15], %22 {strides = array<i32>} : memref<8x128xf32, #tpu.memory_space<vmem>>, vector<8x128xf32>,
    return
  }
  func.func @transform_0(%arg0: i32) -> (i32, i32) {
    %c0_i32 = arith.constant 0 : i32
    %c0_i32_0 = arith.constant 0 : i32
    return %c0_i32, %arg0 : i32, i32
  }
  func.func @transform_1(%arg0: i32) -> (i32, i32) {
    %c0_i32 = arith.constant 0 : i32
    %c0_i32_0 = arith.constant 0 : i32
    %c0_i32_1 = arith.constant 0 : i32
    return %c0_i32, %c0_i32_0 : i32, i32
  }
  func.func @transform_2(%arg0: i32) -> (i32, i32) {
    %c0_i32 = arith.constant 0 : i32
    %c0_i32_0 = arith.constant 0 : i32
    %c0_i32_1 = arith.constant 0 : i32
    return %c0_i32, %c0_i32_0 : i32, i32
  }
  func.func @transform_3(%arg0: i32) -> (i32, i32) {
    %c0_i32 = arith.constant 0 : i32
    %c0_i32_0 = arith.constant 0 : i32
    %c0_i32_1 = arith.constant 0 : i32
    return %c0_i32, %c0_i32_0 : i32, i32
  }
  func.func @transform_4(%arg0: i32) -> (i32, i32) {
    %c0_i32 = arith.constant 0 : i32
    %c0_i32_0 = arith.constant 0 : i32
    %c0_i32_1 = arith.constant 0 : i32
    return %c0_i32, %c0_i32_0 : i32, i32
  }
  func.func @transform_5(%arg0: i32) -> (i32, i32) {
    %c0_i32 = arith.constant 0 : i32
    %c0_i32_0 = arith.constant 0 : i32
    %c0_i32_1 = arith.constant 0 : i32
    return %c0_i32, %c0_i32_0 : i32, i32
  }
  func.func @transform_6(%arg0: i32) -> (i32, i32) {
    %c0_i32 = arith.constant 0 : i32
    %c0_i32_0 = arith.constant 0 : i32
    return %c0_i32, %arg0 : i32, i32
  }
}

</mosaic_0001>

<bundles_post_ra>
// kernel: tpu_custom_call.1
= control target key start
LH: loop header
LB: loop body
LE: loop exit
PB: predicated region body
PF: predicated region fallthrough
CT: control target
= control target key end

     0   :  { %v391_v2 = vmov 0.0|0.0   ;;  %vm392_vm0 = vmmov 0   ;;  %v393_v4 = vmov 0.0   ;;  %s485_s0 = inlined_call_operand.vmem [shape: f32[16,128], index: 0, kind: input, shape index: {}]   ;;  %s486_s1 = inlined_call_operand.vmem [shape: f32[8,16], index: 1, kind: input, shape index: {}]   ;;  %s487_s2 = inlined_call_operand.vmem [shape: f32[8,1], index: 2, kind: input, shape index: {}]   ;;  %s488_s3 = inlined_call_operand.vmem [shape: f32[24,8], index: 3, kind: input, shape index: {}]   ;;  %s489_s4 = inlined_call_operand.vmem [shape: f32[24,1], index: 4, kind: input, shape index: {}]   ;;  %s490_s5 = inlined_call_operand.vmem [shape: f32[8,8], index: 5, kind: input, shape index: {}]   ;;  %s491_s6 = inlined_call_operand.hbm [shape: f32[8,128], index: 6, kind: output, shape index: {}]  }
   0x1   :  { %v25_v0 = vld [vmem:[%s485_s0] sm:$0xff]  ;;  %v26_v1 = vld [vmem:[%s485_s0 + $0x8] sm:$0xff]  ;;  %353 = vmatprep.subr.bf16.mxu0 %v391_v2  ;;  %334 = vmatprep.mubr.msk.f32.mxu0 %vm392_vm0, %v393_v4 }
   0x2   :  { %v354_v3 = vpack.c.bf16 %v26_v1, %v25_v0  ;;  %v27_v5 = vld [vmem:[%s487_s2] sm:$0xff] }
   0x3   :  { %11 = vsyncpa [#allocation3], 0  ;;  %v394_v6 = vmov 0   ;;  %337 = vmatprep.subr.mxu1 %v393_v4  ;;  %v24_v7 = vld [vmem:[%s486_s1] sm:$0xff]  ;;  %vm33_vm1 = vcmask 130048   ;;  %339 = vmatprep.mubr.msk.f32.mxu1 %vm392_vm0, %v393_v4  ;;  %v117_v9 = vld [vmem:[%s489_s4 + $0x8] sm:$0xff] }
   0x4   :  { %361 = vset.pattern.permute.xlu0 %v394_v6  ;;  %355 = vmatpush3.bf16.msra.mxu0 %v354_v3  ;;  %v116_v8 = vld [vmem:[%s489_s4] sm:$0xff]  ;;  %v118_v10 = vld [vmem:[%s489_s4 + $0x10] sm:$0xff]  ;;  %vm134_vm2 = vcmask 64512   ;;  %v114_v20 = vld [vmem:[%s488_s3 + $0x8] sm:$0xff] }
   0x5   :  { %30 = vperm.xlu0 %361, %v27_v5   ;;  %362 = vset.pattern.permute.xlu1 %v394_v6  ;;  %v113_v18 = vld [vmem:[%s488_s3] sm:$0xff]  ;;  %v115_v21 = vld [vmem:[%s488_s3 + $0x10] sm:$0xff]  ;;  %s395_s3 = smov [#allocation2]  }
   0x6   :  { %348 = vmatprep.subr.mxu0 %v393_v4  ;;  %126 = vperm.xlu1 %362, %v117_v9   ;;  %v226_v36 = vld [vmem:[%s490_s5] sm:$0xff]  ;;  %s307_s15 = sshll.u32 %s395_s3, 4  ;;  %s308_s15 = int_to_ptr.vmem [resolvable:$true] %s307_s15 }
   0x7   :  { %335 = vmatmul.mubr.msk.f32.vlgmr.msra.gmra.mrb[0].mxu0 %vm33_vm1, %v24_v7  ;;  %s367_s16 = scalar_lea.vmem %s308_s15, 128  ;;  %p372_p1 = scmp.lt.s32.totalorder %s308_s15, %s308_s15 }
   0x8   :  { %350 = vmatprep.mubr.msk.f32.mxu0 %vm392_vm0, %v393_v4  ;;  %p368_p0 = scmp.ne.s32.totalorder %s308_s15, %s367_s16  ;;  %p373_p2 = scmp.lt.s32.totalorder %s367_s16, %s367_s16 }
   0x9   :  { %121 = vperm.xlu0 %361, %v116_v8  }
   0xa   :  { %131 = vperm.xlu1 %362, %v118_v10   ;;  %p374_p3 = por %p373_p2, %p372_p1 }
   0xc   :  { %p375_p4 = pnand %p374_p3, %p368_p0 }
  0x84   :  { %v31_v11 = vpop.permute.xlu0 %30 }
  0x85   :  { %v127_v24 = vpop.permute.xlu1 %126 }
  0x88   :  { %v122_v25 = vpop.permute.xlu0 %121 }
  0x89   :  { %v132_v31 = vpop.permute.xlu1 %131 }
  0xda   :  { %v103_v12 = vpop.f32.mrb[0].mxu0 }
  0xdb   :  { %v104_v13 = vadd.f32 %v103_v12, %v31_v11  ;;  %v336_v14 = vpop.f32.mrb[1].mxu0 }
  0xdd   :  { %v316_v15 = vmul.f32 -1.442695, %v104_v13 }
  0xdf   :  { %363 = vpow2.f32 %v316_v15 }
  0xe9   :  { %v364_v16 = vpop.eup %363 }
  0xea   :  { %v110_v17 = vadd.f32 1.0, %v364_v16 }
  0xec   :  { %365 = vrcp.f32 %v110_v17 }
  0xf6   :  { %v366_v19 = vpop.eup %365 }
  0xf7   :  { %338 = vmatpush3.msra.mxu1 %v366_v19 }
  0xf8   :  { %340 = vmatmul.mubr.msk.f32.vlgmr.msra.gmra.mrb[0].mxu1 %vm134_vm2, %v113_v18 }
  0xf9   :  { %342 = vmatprep.mubr.msk.f32.mxu1 %vm392_vm0, %v393_v4 }
  0xfc   :  { %343 = vmatmul.mubr.msk.f32.gmra.mrb[2].mxu1 %vm134_vm2, %v114_v20 }
  0xfd   :  { %345 = vmatprep.mubr.msk.f32.mxu1 %vm392_vm0, %v393_v4 }
 0x100   :  { %346 = vmatmul.mubr.msk.f32.gmra.mrb[4].mxu1 %vm134_vm2, %v115_v21 }
 0x1cb   :  { %v210_v22 = vpop.f32.mrb[0].mxu1 }
 0x1cc   :  { %v341_v23 = vpop.f32.mrb[1].mxu1  ;;  %v211_v27 = vadd.f32 %v210_v22, %v122_v25 }
 0x1cf   :  { %v215_v26 = vpop.f32.mrb[2].mxu1 }
 0x1d0   :  { %v216_v28 = vadd.f32 %v215_v26, %v127_v24  ;;  %v344_v29 = vpop.f32.mrb[3].mxu1 }
 0x1d2   :  { %v224_v30 = vmul.f32 %v216_v28, %v211_v27 }
 0x1d3   :  { %v220_v32 = vpop.f32.mrb[4].mxu1 }
 0x1d4   :  { %v221_v33 = vadd.f32 %v220_v32, %v132_v31  ;;  %v347_v34 = vpop.f32.mrb[5].mxu1 }
 0x1d6   :  { %v225_v35 = vmul.f32 %v224_v30, %v221_v33 }
 0x1d8   :  { %349 = vmatpush3.msra.mxu0 %v225_v35 }
 0x1d9   :  { %351 = vmatmul.mubr.msk.f32.vlgmr.msra.gmra.mrb[2].mxu0 %vm134_vm2, %v226_v36 }
 0x2ac   :  { %v296_v37 = vpop.f32.mrb[2].mxu0 }
 0x2ad   :  { %300 = vst [vmem:[#allocation2] sm:$0xff] %v296_v37  ;;  %v352_v38 = vpop.f32.mrb[3].mxu0 }
 0x2ae   :  { %378 = shalt.err (!%p375_p4)
}
 0x2af   :  { %s379_s5 = scalar_lea.hbm %s491_s6, 128 }
 0x2b0   :  { %p380_p5 = scmp.ne.s32.totalorder %s491_s6, %s379_s5  ;;  %p383_p6 = scmp.lt.u32.totalorder %s379_s5, %s491_s6 }
 0x2b2   :  { %p385_p7 = pnand %p383_p6, %p380_p5 }
 0x2b4   :  { %388 = shalt.err (!%p385_p7)
}
 0x2b5   :  { %310 = dma.vmem_to_hbm [thread:$0]  %s308_s15, 128, %s491_s6, [#allocation3]  }
 0x2b6   :  { %389 = dma.done.wait [#allocation3], 128  }
 0x2b7   :  { %390 = vsyncadd [#allocation3], 4294967168 }
 0x2b8   :  { %314 = vsyncpa [#allocation3], 1 }

</bundles_post_ra>
